<compile_context>
chip_gen: v7x
topology: tpu7x:2x2x1
jax: 0.10.0
libtpu: 0.0.40
codegen_flags: <defaults>
</compile_context>

<pallas_src>
import functools

import jax
import jax.numpy as jnp
from jax.experimental import pallas as pl
from jax.experimental.pallas import tpu as pltpu


def _round_up(x: int, m: int) -> int:
    return (x + m - 1) // m * m


def _vmem_estimate_bytes(tile_n: int, dp: int, vp: int) -> int:
    """Rough double-buffered VMEM footprint for one grid step."""
    x_bufs = 2 * tile_n * dp * 4
    emb_bufs = 2 * tile_n * dp * 4
    idx_bufs = 2 * tile_n * 4
    cb_bufs = 2 * vp * dp * 4
    cb2_bufs = 2 * vp * 4
    temps = 6 * tile_n * vp * 4          # xc, d2, logits, p, cand + slack
    return x_bufs + emb_bufs + idx_bufs + cb_bufs + cb2_bufs + temps


_VMEM_BUDGET = 24 << 20                  # conservative: fits v7x 64 MiB/TC


def _pick_tile_n(n: int, dp: int, vp: int) -> int:
    """Largest row tile that fits the VMEM budget; keep >= 2 grid steps."""
    tile = 1024
    while tile > 64 and _vmem_estimate_bytes(tile, dp, vp) > _VMEM_BUDGET:
        tile //= 2
    half = max(8, _round_up((n + 1) // 2, 8))   # >= 2 steps (v7x has 2 TCs)
    return min(tile, half)


def _softvq_kernel(x_ref, cb_ref, cb2_ref, embed_ref, idx_ref, *,
                   temp: float, vocab_size: int, use_bf16_matmul: bool):
    x = x_ref[...]                       # (TN, Dp) f32, feature cols zero-padded
    cb = cb_ref[...]                     # (Vp, Dp) f32, rows/cols zero-padded
    c2 = cb2_ref[...]                    # (1, Vp)  f32, hoisted ||codebook||^2
    tn = x.shape[0]
    vp = cb.shape[0]

    if use_bf16_matmul:
        x_mm = x.astype(jnp.bfloat16)
        cb_mm = cb.astype(jnp.bfloat16)
    else:
        x_mm, cb_mm = x, cb

    # Squared euclidean distances via ||x||^2 + ||c||^2 - 2 x.c (MXU matmul).
    x2 = jnp.sum(x * x, axis=-1, keepdims=True)                      # (TN, 1)
    xc = jax.lax.dot_general(x_mm, cb_mm, (((1,), (1,)), ((), ())),
                             preferred_element_type=jnp.float32)     # (TN, Vp)
    d2 = jnp.maximum(x2 + c2 - 2.0 * xc, 0.0)                        # (TN, Vp)

    lane = jax.lax.broadcasted_iota(jnp.int32, (tn, vp), 1)
    if vocab_size < vp:                  # mask zero-padded codebook rows
        valid = lane < vocab_size
        d2_am = jnp.where(valid, d2, jnp.inf)
    else:
        valid = None
        d2_am = d2

    # argmin over the codebook axis (first occurrence on ties). sqrt is
    # monotone so argmin on d2 == argmin on true distances.
    min_d = jnp.min(d2_am, axis=-1, keepdims=True)
    cand = jnp.where(d2_am == min_d, lane.astype(jnp.float32), float(vp))
    idx_row = jnp.min(cand, axis=-1)                                 # (TN,)
    idx_ref[0, 0, :] = idx_row.astype(jnp.int32)   # lane-dense idx store

    # softmax(log(dist + 1e-8) * temp): log(sqrt(d2)) == 0.5*log(d2), so the
    # sqrt EUP pass is dropped; eps^2 = 1e-16 keeps log(0) == log(1e-8).
    logits = (0.5 * float(temp)) * jnp.log(d2 + 1e-16)
    if valid is not None:
        logits = jnp.where(valid, logits, -jnp.inf)
    m = jnp.max(logits, axis=-1, keepdims=True)
    p = jnp.exp(logits - m)
    denom = jnp.sum(p, axis=-1, keepdims=True)
    # EUP approx reciprocal + two cheap Newton refinements (full f32 accuracy,
    # cost is O(tile_n) VPU ops only).
    inv = pl.reciprocal(denom, approx=True)
    inv = inv * (2.0 - denom * inv)
    inv = inv * (2.0 - denom * inv)
    attn = p * inv

    # embed = attn @ codebook  (padded rows of cb are zero and attn is 0 there)
    embed_ref[...] = jnp.dot(attn.astype(cb_mm.dtype), cb_mm,
                             preferred_element_type=jnp.float32
                             ).astype(embed_ref.dtype)


def _softvq_flat(x_flat: jax.Array, codebook: jax.Array, temp: float, *,
                 use_bf16_matmul: bool = False, tile_n: int | None = None):
    """x_flat: (N, D) f32, codebook: (V, D) f32 -> (embed (N, D), idx (N,))."""
    n, d = x_flat.shape
    v, d_cb = codebook.shape
    assert d == d_cb

    dp = _round_up(d, 128)
    vp = _round_up(v, 128)

    # Zero-pad the feature dim once (lane-dense loads/stores + aligned MXU K);
    # zeros change neither the distances nor either matmul.
    if dp != d:
        x_flat = jnp.pad(x_flat, ((0, 0), (0, dp - d)))
    cb_p = codebook
    if dp != d or vp != v:
        cb_p = jnp.pad(codebook, ((0, vp - v), (0, dp - d)))
    # Hoisted codebook row norms (constant across all grid steps).
    cb2 = jnp.sum(cb_p * cb_p, axis=-1)[None, :].astype(jnp.float32)  # (1, Vp)

    if tile_n is None:
        tile_n = _pick_tile_n(n, dp, vp)
    grid_n = -(-n // tile_n)

    kernel = functools.partial(_softvq_kernel, temp=float(temp), vocab_size=v,
                               use_bf16_matmul=use_bf16_matmul)

    cost = pl.CostEstimate(
        flops=4 * n * vp * dp,                   # two (N, Vp, Dp) matmuls
        transcendentals=3 * n * vp,              # log + exp (+ recip slack)
        bytes_accessed=8 * n * dp + 4 * vp * dp + 4 * n)

    vmem_limit = int(min(max(2 * _vmem_estimate_bytes(tile_n, dp, vp),
                             32 << 20), 48 << 20))

    embed, idx = pl.pallas_call(
        kernel,
        out_shape=(
            jax.ShapeDtypeStruct((n, dp), jnp.float32),
            jax.ShapeDtypeStruct((grid_n, 1, tile_n), jnp.int32),
        ),
        grid_spec=pltpu.PrefetchScalarGridSpec(
            num_scalar_prefetch=0,
            grid=(grid_n,),
            in_specs=[
                pl.BlockSpec((tile_n, dp), lambda i: (i, 0)),   # x row tile
                pl.BlockSpec((vp, dp), lambda i: (0, 0)),       # full codebook
                pl.BlockSpec((1, vp), lambda i: (0, 0)),        # hoisted ||c||^2
            ],
            out_specs=[
                pl.BlockSpec((tile_n, dp), lambda i: (i, 0)),
                pl.BlockSpec((1, 1, tile_n), lambda i: (i, 0, 0)),
            ],
        ),
        compiler_params=pltpu.CompilerParams(
            dimension_semantics=("parallel",),
            vmem_limit_bytes=vmem_limit),
        cost_estimate=cost,
    )(x_flat, cb_p, cb2)

    idx_flat = idx.reshape(-1)[:n]
    if dp != d:
        embed = embed[:, :d]
    return embed, idx_flat


class SoftVQ:
    """JAX/Pallas port of SoftVQLayer (forward only, kmeans init skipped)."""

    def __init__(self, vocab_size: int, embed_dim: int, dim=-1, temp=1.0,
                 key=None, use_bf16_matmul: bool = False):
        self.vocab_size = vocab_size
        self.embed_dim = embed_dim
        self.dim = dim
        self.temp = temp
        self.use_bf16_matmul = use_bf16_matmul
        if key is None:
            key = jax.random.PRNGKey(42)
        # Deterministic synthetic codebook (module's nn.Parameter(empty(V, D))).
        self.codebook = jax.random.normal(
            key, (vocab_size, embed_dim), dtype=jnp.float32)
        # TODO(synk): KMeans-based _init() (training-time, data-dependent) is not
        # reproduced; codebook is initialized deterministically instead.

    def __call__(self, x: jax.Array):
        x = jnp.moveaxis(x, self.dim, -1)
        batch_shape = x.shape[:-1]
        x_flat = x.reshape(-1, x.shape[-1]).astype(jnp.float32)

        embed, idx = _softvq_flat(
            x_flat, self.codebook, self.temp,
            use_bf16_matmul=self.use_bf16_matmul)

        idxes = idx.reshape(batch_shape)
        embed = embed.reshape(*batch_shape, self.embed_dim)
        embed = jnp.moveaxis(embed, -1, self.dim)
        return embed, idxes


def _reference(x, codebook, dim, temp):
    """Pure-JAX reference mirroring the PyTorch forward."""
    x = jnp.moveaxis(x, dim, -1)
    batch_shape = x.shape[:-1]
    xf = x.reshape(-1, x.shape[-1]).astype(jnp.float32)
    diff = xf[:, None, :] - codebook[None, :, :]
    dists = jnp.sqrt(jnp.maximum(jnp.sum(diff * diff, -1), 0.0))
    idx = jnp.argmin(dists, -1).astype(jnp.int32)
    attn = jax.nn.softmax(jnp.log(dists + 1e-8) * temp, -1)
    embed = attn @ codebook
    embed = embed.reshape(*batch_shape, -1)
    embed = jnp.moveaxis(embed, -1, dim)
    return embed, idx.reshape(batch_shape)


if __name__ == "__main__":
    root = jax.random.PRNGKey(0)

    def run_case(shape, vocab_size, dim, temp, case_key):
        k_x, k_cb = jax.random.split(case_key)
        x = jax.random.normal(k_x, shape, dtype=jnp.float32)
        embed_dim = shape[dim]
        layer = SoftVQ(vocab_size=vocab_size, embed_dim=embed_dim, dim=dim,
                       temp=temp, key=k_cb)

        embed, idxes = layer(x)
        embed = jax.block_until_ready(embed)
        idxes = jax.block_until_ready(idxes)

        assert embed.shape == x.shape, (embed.shape, x.shape)
        expected_idx_shape = tuple(
            s for a, s in enumerate(x.shape) if a != (dim % x.ndim))
        assert idxes.shape == expected_idx_shape, idxes.shape

        ref_embed, ref_idx = _reference(x, layer.codebook, dim, temp)
        assert jnp.allclose(embed, ref_embed, atol=1e-4, rtol=1e-4)
        assert jnp.array_equal(idxes, ref_idx)

    keys = jax.random.split(root, 2)
    # NCHW-like input (dim=1 is the channel/embedding axis).
    run_case((2, 32, 8, 8), vocab_size=16, dim=1, temp=1.0, case_key=keys[0])
    # Odd shapes: exercises D/V padding, the partial tail row-block, temp != 1.
    run_case((2, 48, 5, 7), vocab_size=20, dim=1, temp=0.7, case_key=keys[1])

    print("KERNEL_OK")
</pallas_src>

<mosaic_0001>
module attributes {stable_mosaic.version = 11 : i64} {
  func.func @_softvq_kernel(%arg0: i32, %arg1: memref<64x128xf32, #tpu.memory_space<vmem>>, %arg2: memref<128x128xf32, #tpu.memory_space<vmem>>, %arg3: memref<1x128xf32, #tpu.memory_space<vmem>>, %arg4: memref<64x128xf32, #tpu.memory_space<vmem>>, %arg5: memref<1x1x64xi32, #tpu.memory_space<vmem>>) attributes {dimension_semantics = [#tpu.dimension_semantics<parallel>], iteration_bounds = array<i64: 2>, scalar_prefetch = 0 : i64, scratch_operands = 0 : i64, tpu.core_type = #tpu.core_type<tc>, window_params = [{transform_indices = @transform_0, window_bounds = array<i64: 64, 128>}, {pipeline_mode = #tpu.pipeline_mode<synchronous>, transform_indices = @transform_1, window_bounds = array<i64: 128, 128>}, {pipeline_mode = #tpu.pipeline_mode<synchronous>, transform_indices = @transform_2, window_bounds = array<i64: 1, 128>}, {transform_indices = @transform_3, window_bounds = array<i64: 64, 128>}, {transform_indices = @transform_4, window_bounds = array<i64: 1, 1, 64>}]} {
    %c0 = arith.constant 0 : index
    %c0_0 = arith.constant 0 : index
    %0 = vector.load %arg1[%c0, %c0_0] : memref<64x128xf32, #tpu.memory_space<vmem>>, vector<64x128xf32>
    %c0_1 = arith.constant 0 : index
    %c0_2 = arith.constant 0 : index
    %1 = vector.load %arg2[%c0_1, %c0_2] : memref<128x128xf32, #tpu.memory_space<vmem>>, vector<128x128xf32>
    %c0_3 = arith.constant 0 : index
    %c0_4 = arith.constant 0 : index
    %2 = vector.load %arg3[%c0_3, %c0_4] : memref<1x128xf32, #tpu.memory_space<vmem>>, vector<1x128xf32>
    %3 = arith.mulf %0, %0 : vector<64x128xf32>
    %cst = arith.constant dense<0.000000e+00> : vector<64xf32>
    %4 = vector.multi_reduction <add>, %3, %cst [1] : vector<64x128xf32> to vector<64xf32>
    %5 = vector.shape_cast %4 : vector<64xf32> to vector<64x1xf32>
    %cst_5 = arith.constant dense<0.000000e+00> : vector<64x128xf32>
    %6 = tpu.matmul %0, %1, %cst_5 {dimension_numbers = #tpu.dot_dimension_numbers<[1], [1], [0], [0], [0, 0, 1, 0], [], []>} : vector<64x128xf32>, vector<128x128xf32>, vector<64x128xf32> -> vector<64x128xf32>
    %7 = vector.broadcast %5 : vector<64x1xf32> to vector<64x128xf32>
    %8 = vector.broadcast %2 : vector<1x128xf32> to vector<64x128xf32>
    %9 = arith.addf %7, %8 : vector<64x128xf32>
    %cst_6 = arith.constant 2.000000e+00 : f32
    %10 = vector.broadcast %cst_6 : f32 to vector<64x128xf32>
    %11 = arith.mulf %10, %6 : vector<64x128xf32>
    %12 = arith.subf %9, %11 : vector<64x128xf32>
    %cst_7 = arith.constant 0.000000e+00 : f32
    %13 = vector.broadcast %cst_7 : f32 to vector<64x128xf32>
    %14 = arith.maximumf %12, %13 : vector<64x128xf32>
    %15 = tpu.iota {dimensions = array<i32: 1>} : vector<64x128xi32>
    %c16_i32 = arith.constant 16 : i32
    %16 = vector.broadcast %c16_i32 : i32 to vector<64x128xi32>
    %17 = arith.cmpi slt, %15, %16 : vector<64x128xi32>
    %cst_8 = arith.constant 0x7F800000 : f32
    %18 = vector.broadcast %cst_8 : f32 to vector<64x128xf32>
    %19 = arith.select %17, %14, %18 : vector<64x128xi1>, vector<64x128xf32>
    %cst_9 = arith.constant dense<0x7F800000> : vector<64xf32>
    %20 = vector.multi_reduction <minimumf>, %19, %cst_9 [1] : vector<64x128xf32> to vector<64xf32>
    %21 = vector.shape_cast %20 : vector<64xf32> to vector<64x1xf32>
    %22 = vector.broadcast %21 : vector<64x1xf32> to vector<64x128xf32>
    %23 = arith.cmpf oeq, %19, %22 : vector<64x128xf32>
    %24 = arith.sitofp %15 : vector<64x128xi32> to vector<64x128xf32>
    %cst_10 = arith.constant 1.280000e+02 : f32
    %25 = vector.broadcast %cst_10 : f32 to vector<64x128xf32>
    %26 = arith.select %23, %24, %25 : vector<64x128xi1>, vector<64x128xf32>
    %cst_11 = arith.constant dense<0x7F800000> : vector<64xf32>
    %27 = vector.multi_reduction <minimumf>, %26, %cst_11 [1] : vector<64x128xf32> to vector<64xf32>
    %28 = arith.fptosi %27 : vector<64xf32> to vector<64xi32>
    %c0_12 = arith.constant 0 : index
    %c0_13 = arith.constant 0 : index
    %c0_14 = arith.constant 0 : index
    %29 = vector.load %arg5[%c0_12, %c0_13, %c0_14] : memref<1x1x64xi32, #tpu.memory_space<vmem>>, vector<1x1x64xi32>
    %30 = vector.shape_cast %29 : vector<1x1x64xi32> to vector<64xi32>
    %31 = vector.shape_cast %28 : vector<64xi32> to vector<1x1x64xi32>
    tpu.vector_store %arg5[%c0_12, %c0_13, %c0_14], %31 {strides = array<i32>} : memref<1x1x64xi32, #tpu.memory_space<vmem>>, vector<1x1x64xi32>,
    %cst_15 = arith.constant 1.000000e-16 : f32
    %32 = vector.broadcast %cst_15 : f32 to vector<64x128xf32>
    %33 = arith.addf %14, %32 : vector<64x128xf32>
    %34 = math.log %33 : vector<64x128xf32>
    %cst_16 = arith.constant 5.000000e-01 : f32
    %35 = vector.broadcast %cst_16 : f32 to vector<64x128xf32>
    %36 = arith.mulf %35, %34 : vector<64x128xf32>
    %cst_17 = arith.constant 0xFF800000 : f32
    %37 = vector.broadcast %cst_17 : f32 to vector<64x128xf32>
    %38 = arith.select %17, %36, %37 : vector<64x128xi1>, vector<64x128xf32>
    %cst_18 = arith.constant dense<0xFF800000> : vector<64xf32>
    %39 = vector.multi_reduction <maximumf>, %38, %cst_18 [1] : vector<64x128xf32> to vector<64xf32>
    %40 = vector.shape_cast %39 : vector<64xf32> to vector<64x1xf32>
    %41 = vector.broadcast %40 : vector<64x1xf32> to vector<64x128xf32>
    %42 = arith.subf %38, %41 : vector<64x128xf32>
    %43 = math.exp %42 : vector<64x128xf32>
    %cst_19 = arith.constant dense<0.000000e+00> : vector<64xf32>
    %44 = vector.multi_reduction <add>, %43, %cst_19 [1] : vector<64x128xf32> to vector<64xf32>
    %45 = vector.shape_cast %44 : vector<64xf32> to vector<64x1xf32>
    %46 = tpu.reciprocal %45 {approx = true} : vector<64x1xf32> -> vector<64x1xf32>
    %47 = arith.mulf %45, %46 : vector<64x1xf32>
    %cst_20 = arith.constant 2.000000e+00 : f32
    %48 = vector.broadcast %cst_20 : f32 to vector<64x1xf32>
    %49 = arith.subf %48, %47 : vector<64x1xf32>
    %50 = arith.mulf %46, %49 : vector<64x1xf32>
    %51 = arith.mulf %45, %50 : vector<64x1xf32>
    %cst_21 = arith.constant 2.000000e+00 : f32
    %52 = vector.broadcast %cst_21 : f32 to vector<64x1xf32>
    %53 = arith.subf %52, %51 : vector<64x1xf32>
    %54 = arith.mulf %50, %53 : vector<64x1xf32>
    %55 = vector.broadcast %54 : vector<64x1xf32> to vector<64x128xf32>
    %56 = arith.mulf %43, %55 : vector<64x128xf32>
    %cst_22 = arith.constant dense<0.000000e+00> : vector<64x128xf32>
    %57 = tpu.matmul %56, %1, %cst_22 {dimension_numbers = #tpu.dot_dimension_numbers<[1], [0], [0], [1], [0, 0, 1, 1], [], []>} : vector<64x128xf32>, vector<128x128xf32>, vector<64x128xf32> -> vector<64x128xf32>
    %c0_23 = arith.constant 0 : index
    %c0_24 = arith.constant 0 : index
    %58 = vector.load %arg4[%c0_23, %c0_24] : memref<64x128xf32, #tpu.memory_space<vmem>>, vector<64x128xf32>
    tpu.vector_store %arg4[%c0_23, %c0_24], %57 {strides = array<i32>} : memref<64x128xf32, #tpu.memory_space<vmem>>, vector<64x128xf32>,
    return
  }
  func.func @transform_0(%arg0: i32) -> (i32, i32) {
    %c0_i32 = arith.constant 0 : i32
    %c0_i32_0 = arith.constant 0 : i32
    return %arg0, %c0_i32 : i32, i32
  }
  func.func @transform_1(%arg0: i32) -> (i32, i32) {
    %c0_i32 = arith.constant 0 : i32
    %c0_i32_0 = arith.constant 0 : i32
    %c0_i32_1 = arith.constant 0 : i32
    return %c0_i32, %c0_i32_0 : i32, i32
  }
  func.func @transform_2(%arg0: i32) -> (i32, i32) {
    %c0_i32 = arith.constant 0 : i32
    %c0_i32_0 = arith.constant 0 : i32
    %c0_i32_1 = arith.constant 0 : i32
    return %c0_i32, %c0_i32_0 : i32, i32
  }
  func.func @transform_3(%arg0: i32) -> (i32, i32) {
    %c0_i32 = arith.constant 0 : i32
    %c0_i32_0 = arith.constant 0 : i32
    return %arg0, %c0_i32 : i32, i32
  }
  func.func @transform_4(%arg0: i32) -> (i32, i32, i32) {
    %c0_i32 = arith.constant 0 : i32
    %c0_i32_0 = arith.constant 0 : i32
    %c0_i32_1 = arith.constant 0 : i32
    return %arg0, %c0_i32, %c0_i32_0 : i32, i32, i32
  }
}

</mosaic_0001>

<bundles_post_ra>
// kernel: tpu_custom_call.1
= control target key start
LH: loop header
LB: loop body
LE: loop exit
PB: predicated region body
PF: predicated region fallthrough
CT: control target
= control target key end

     0   :  { %10 = vsyncpa [#allocation3], 0  ;;  %s1918_s0 = inlined_call_operand.hbm [shape: f32[128,128], index: 0, kind: input, shape index: {}]   ;;  %s1919_s1 = inlined_call_operand.hbm [shape: f32[128,128], index: 1, kind: input, shape index: {}]   ;;  %s1920_s2 = inlined_call_operand.vmem [shape: f32[1,128], index: 2, kind: input, shape index: {}]   ;;  %s1921_s3 = inlined_call_operand.hbm [shape: f32[128,128], index: 3, kind: output, shape index: {0}]   ;;  %s1922_s4 = inlined_call_operand.hbm [shape: s32[2,1,64], index: 4, kind: output, shape index: {1}]  }
   0x1   :  { %12 = vsyncpa [#allocation3 + $0x1], 0 }
   0x2   :  { %13 = vsyncpa [#allocation6], 0 }
   0x3   :  { %14 = vsyncpa [#allocation4], 0 }
   0x4   :  { %16 = vsyncpa [#allocation4 + $0x1], 0 }
   0x5   :  { %17 = vsyncpa [#allocation9], 0 }
   0x6   :  { %19 = vsyncpa [#allocation9 + $0x1], 0  ;;  %s1518_s15 = smov 0   ;;  %s1520_s16 = smov 0  }
   0x7   :  { %s1522_s17 = smov 0   ;;  %s1524_s18 = smov 0  }
   0x8 LB: > { %s1539_s19 = sadd.s32 4294967295, %s1483_s18   ;;  %s973_s20 = sadd.s32 4294967294, %s1483_s18   ;;  %s1483_s18 = sphi %s1524_s18, %s1942_s18   ;;  %s1479_s17 = sphi %s1522_s17, %s1941_s17   ;;  %s1475_s16 = sphi %s1520_s16, %s1940_s16   ;;  %s1471_s15 = sphi %s1518_s15, %s1939_s15  }
   0x9   : > { %p45_p0 = scmp.ne.s32.totalorder %s1475_s16, %s1471_s15  ;;  %p1923_p1 = scmp.eq.s32.totalorder %s1539_s19, 0 }
   0xa   : > { %p117_p3 = scmp.eq.s32.totalorder %s973_s20, 1  ;;  %p974_p5 = scmp.ge.s32.totalorder %s1483_s18, 1 }
   0xb   : > { %p1548_p4 = por %p1923_p1, %p45_p0  ;;  %p150_p7 = scmp.lt.s32.totalorder %s1483_s18, 3 }
   0xc   : > { %p1553_p6 = por %p117_p3, %p45_p0  ;;  %s1485_s24 = smov [#allocation5]  }
   0xd   : > { %s1926_s21 = scalar_select %p1548_p4, 1, 0 }
   0xe   : > { %s1927_s22 = scalar_select %p1553_p6, 1, 0 }
   0xf   : > { %p1558_p8 = pnand %p974_p5, %p150_p7  ;;  %s162_s25 = sshll.u32 %s1485_s24, 4  ;;  %s1562_s25 = int_to_ptr.vmem [resolvable:$true] %s162_s25 }
  0x10   : > { %s1574_s27 = sadd.s32 1, %s1483_s18   ;;  %s32_s28 = sadd.s32 1, %s1479_s17 }
  0x11   : > { %s1928_s23 = scalar_select %p1558_p8, 1, 0 }
  0x12   : > { %p1219_p9 = pneg %p1558_p8  ;;  %s29_s29 = ssub.s32 %s1483_s18, %s1574_s27 }
  0x13   : > { %s1323_s6 = scalar_lea.hbm %s1919_s1, 2048 }
  0x14   : > { %p1569_p11 = pnand %p1219_p9, %p1923_p1  ;;  %p1324_p12 = scmp.ne.s32.totalorder %s1919_s1, %s1323_s6 }
  0x15   : > { %p1330_p5 = scmp.lt.u32.totalorder %s1323_s6, %s1919_s1 }
  0x16   : > { %p1325_p13 = pneg %p1569_p11 }
  0x18   : > { %p1326_p0 = pnand %p1325_p13, %p1324_p12 }
  0x1a   : > { %p1327_p3 = pneg %p1326_p0 }
  0x1c   : > { %p1332_p7 = pnand %p1330_p5, %p1327_p3 }
  0x1e   : > { %1335 = shalt.err (!%p1332_p7)
}
  0x1f   : > { %s1336_s11 = scalar_lea.vmem %s1562_s25, 2048  ;;  %p1344_p2 = scmp.lt.s32.totalorder %s1562_s25, %s1562_s25 }
  0x20   : > { %p1337_p9 = scmp.ne.s32.totalorder %s1562_s25, %s1336_s11  ;;  %p1345_p6 = scmp.lt.s32.totalorder %s1336_s11, %s1336_s11 }
  0x22   : > { %p1339_p10 = pnand %p1337_p9, %p1325_p13  ;;  %p1346_p4 = por %p1345_p6, %p1344_p2 }
  0x24   : > { %p1340_p1 = pneg %p1339_p10 }
  0x26   : > { %p1347_p8 = pnand %p1346_p4, %p1340_p1 }
  0x28   : > { %1350 = shalt.err (!%p1347_p8)
}
  0x29   : > { %s1486_s12 = smov 128   ;;  %s1487_s13 = smov 8  }
  0x2a   : > { %1222 = dma.hbm_to_vmem [thread:$0]  (!%p1569_p11), %s1919_s1, 2048, %s1562_s25, [#allocation6], %s1486_s12, %s1486_s12, %s1487_s13  }
  0x2b   : > { %p30_p1 = scmp.eq.s32.totalorder %s29_s29, 0  ;;  %p39_p2 = scmp.ne.s32.totalorder %s1479_s17, %s1475_s16 }
  0x2c   : > { %p40_p4 = scmp.eq.s32.totalorder %s1483_s18, 0  ;;  %p1235_p6 = scmp.lt.s32.totalorder %s1483_s18, 2 }
  0x2d   : > { %s1608_s24 = scalar_select %p30_p1, %s1479_s17, %s32_s28  }
  0x2e   : > { %p41_p8 = por %p40_p4, %p39_p2  ;;  %p1930_p10 = scmp.eq.s32.totalorder %s1539_s19, 1 }
  0x2f   : > { %s179_s26 = sand.u32 1, %s1479_s17   ;;  %s991_s5 = sshll.u32 %s1483_s18, 10 }
  0x30   : > { %p1612_p12 = por %p1930_p10, %p39_p2  ;;  %s977_s6 = sshll.u32 %s179_s26, 6 }
  0x31   : > { %s1621_s9 = scalar_lea.hbm %s1918_s0, %s991_s5  ;;  %s183_s25 = scalar_lea.vmem [#allocation2], %s977_s6 }
  0x32   : > { %s190_s28 = sshll.u32 %s183_s25, 4  ;;  %p1623_p11 = pnand %p1235_p6, %p41_p8  ;;  %s1627_s28 = int_to_ptr.vmem [resolvable:$true] %s190_s28 }
  0x33   : > { %s1629_s10 = scalar_lea.sflag [#allocation3], %s179_s26  ;;  %s1351_s11 = scalar_lea.hbm %s1621_s9, 1024 }
  0x34   : > { %p1352_p13 = scmp.ne.s32.totalorder %s1621_s9, %s1351_s11  ;;  %p1353_p0 = pneg %p1623_p11 }
  0x35   : > { %s1356_s5 = scalar_lea.hbm %s1918_s0, 2048  ;;  %p1357_p7 = scmp.lt.u32.totalorder %s1621_s9, %s1918_s0 }
  0x36   : > { %p1354_p3 = pnand %p1353_p0, %p1352_p13  ;;  %p1358_p9 = scmp.lt.u32.totalorder %s1356_s5, %s1351_s11 }
  0x37   : > { %p1360_p2 = scmp.lt.u32.totalorder %s1351_s11, %s1621_s9 }
  0x38   : > { %p1355_p5 = pneg %p1354_p3  ;;  %p1359_p1 = por %p1358_p9, %p1357_p7 }
  0x3a   : > { %p1361_p4 = por %p1360_p2, %p1359_p1 }
  0x3c   : > { %p1362_p6 = pnand %p1361_p4, %p1355_p5 }
  0x3e   : > { %1365 = shalt.err (!%p1362_p6)
}
  0x3f   : > { %s1366_s26 = scalar_lea.vmem %s1627_s28, 1024  ;;  %s1488_s8 = smov [#allocation2]  }
  0x40   : > { %p1367_p8 = scmp.ne.s32.totalorder %s1627_s28, %s1366_s26  ;;  %s1371_s25 = sshll.u32 %s1488_s8, 4  ;;  %s1372_s25 = int_to_ptr.vmem [resolvable:$false] %s1371_s25 }
  0x41   : > { %s1373_s14 = scalar_lea.vmem %s1372_s25, 2048  ;;  %p1374_p3 = scmp.lt.s32.totalorder %s1627_s28, %s1372_s25 }
  0x42   : > { %p1369_p10 = pnand %p1367_p8, %p1353_p0  ;;  %p1375_p7 = scmp.lt.s32.totalorder %s1373_s14, %s1366_s26 }
  0x44   : > { %p1370_p13 = pneg %p1369_p10  ;;  %p1376_p9 = por %p1375_p7, %p1374_p3 }
  0x46   : > { %p1377_p1 = pnand %p1376_p9, %p1370_p13 }
  0x48   : > { %1380 = shalt.err (!%p1377_p1)
}
  0x49   : > { %1226 = dma.hbm_to_vmem [thread:$0]  (!%p1623_p11), %s1621_s9, 1024, %s1627_s28, %s1629_s10, %s1486_s12, %s1486_s12, %s1487_s13  }
  0x4a   : > { %p1933_p0 = scmp.ne.s32.totalorder %s1928_s23, 0 }
  0x4b   : > { %s1663_s11 = sand.u32 (!%p1933_p0), 1, %s1475_s16   ;;  %p1934_p5 = scmp.ne.s32.totalorder (!%p1933_p0), %s1926_s21, 0 }
  0x4c   : > { %202 = sbr.rel (%p1933_p0) target bundleno = 958 (0x3be), region = 32  ;;  %s981_s20 = sshll.u32 (!%p1933_p0), %s1663_s11, 6 }
  0x4d   : > { %s205_s5 = scalar_lea.sflag (!%p1933_p0), [#allocation3], %s1663_s11  ;;  %s1669_s29 = scalar_lea.vmem (!%p1933_p0), [#allocation2], %s981_s20 }
  0x53   : > { %1454 = dma.done.wait (%p1934_p5), %s205_s5, 1024  }
  0x54   : > { %1456 = vsyncadd (%p1934_p5), %s205_s5, 4294966272  ;;  %p1935_p11 = scmp.eq.s32.totalorder %s1539_s19, 0 }
  0x56   : > { %1458 = dma.done.wait (%p1935_p11), [#allocation6], 2048   ;;  %p1936_p2 = pmov %p1935_p11 }
  0x57   : > { %v251_v0 = vld [vmem:[#allocation5] sm:$0xff]  ;;  %v252_v1 = vld [vmem:[#allocation5 + $0x8] sm:$0xff]  ;;  %v253_v2 = vld [vmem:[#allocation5 + $0x10] sm:$0xff]  ;;  %v435_v44 = vlaneseq  ;;  %vm512_vm9 = vcmask 130112   ;;  %vm519_vm10 = vcmask 195712   ;;  %vm526_vm11 = vcmask 261312  }
  0x58   : > { %1460 = vsyncadd (%p1936_p2), [#allocation6], 4294965248  ;;  %v1129_v3 = vpack.c.bf16 %v252_v1, %v251_v0  ;;  %v254_v4 = vld [vmem:[#allocation5 + $0x18] sm:$0xff]  ;;  %v255_v6 = vld [vmem:[#allocation5 + $0x20] sm:$0xff]  ;;  %vm533_vm12 = vcmask 326912   ;;  %vm540_vm13 = vcmask 392512  }
  0x59   : > { %v1133_v5 = vpack.c.bf16 %v254_v4, %v253_v2  ;;  %v256_v7 = vld [vmem:[#allocation5 + $0x28] sm:$0xff]  ;;  %v243_v8 = vld [vmem:[%s1669_s29] sm:$0xff]  ;;  %v1681_v9 = vld [vmem:[%s1669_s29 + $0x10] sm:$0xff]  ;;  %v1696_v48 = vand.u32 127, %v435_v44  ;;  %vm547_vm14 = vcmask 458112   ;;  %s988_s12 = sshll.u32 %s1539_s19, 4 }
  0x5a   : > { %1130 = vmatprep.subr.bf16.mxu0 %v1129_v3  ;;  %1162 = vmatprep.subr.bf16.mxu1 %v1129_v3  ;;  %v268_v10 = vmul.f32 %v243_v8, %v243_v8  ;;  %v1137_v11 = vpack.c.bf16 %v256_v7, %v255_v6  ;;  %v244_v12 = vld [vmem:[%s1669_s29 + $0x8] sm:$0xff]  ;;  %v270_v13 = vmul.f32 %v1681_v9, %v1681_v9  ;;  %v246_v14 = vld [vmem:[%s1669_s29 + $0x18] sm:$0xff]  ;;  %v257_v17 = vld [vmem:[#allocation5 + $0x30] sm:$0xff]  ;;  %s240_s13 = scalar_lea.vmem [#allocation8], %s1663_s11  ;;  %vm554_vm15 = vcmask 523712   ;;  %s1840_s6 = scalar_lea.hbm %s1922_s4, %s988_s12 }
  0x5b   : > { %1132 = vmatpush3.bf16.xpose.msra.mxu0 %v1129_v3  ;;  %1164 = vmatpush3.bf16.msra.mxu1 %v1129_v3  ;;  %v269_v15 = vmul.f32 %v244_v12, %v244_v12  ;;  %v271_v16 = vmul.f32 %v246_v14, %v246_v14  ;;  %v258_v18 = vld [vmem:[#allocation5 + $0x38] sm:$0xff]  ;;  %v247_v19 = vld [vmem:[%s1669_s29 + $0x20] sm:$0xff]  ;;  %v248_v20 = vld [vmem:[%s1669_s29 + $0x28] sm:$0xff]  ;;  %vm437_vm0 = vcmp.lt.s32.totalorder %v1696_v48, 16  ;;  %s865_s9 = sshll.u32 %s240_s13, 4  ;;  %s837_s7 = scalar_lea.sflag [#allocation9], %s1663_s11  ;;  %s1842_s9 = int_to_ptr.vmem [resolvable:$true] %s865_s9 }
  0x5c   : > { %1134 = vmatprep.subr.bf16.mxu0 %v1133_v5  ;;  %1166 = vmatprep.subr.bf16.mxu1 %v1133_v5  ;;  %v272_v21 = vmul.f32 %v247_v19, %v247_v19  ;;  %v1141_v22 = vpack.c.bf16 %v258_v18, %v257_v17  ;;  %v273_v23 = vmul.f32 %v248_v20, %v248_v20  ;;  %v259_v24 = vld [vmem:[#allocation5 + $0x40] sm:$0xff]  ;;  %v260_v25 = vld [vmem:[#allocation5 + $0x48] sm:$0xff]  ;;  %v249_v26 = vld [vmem:[%s1669_s29 + $0x30] sm:$0xff]  ;;  %s1381_s26 = scalar_lea.vmem %s1842_s9, 16  ;;  %s1489_s8 = smov [#allocation8]  }
  0x5d   : > { %1073 = vmatprep.mubr.f32.mxu0 %v243_v8  ;;  %276 = vadd.xlane.f32.xlu0 %v268_v10  ;;  %v250_v27 = vld [vmem:[%s1669_s29 + $0x38] sm:$0xff]  ;;  %v274_v28 = vmul.f32 %v249_v26, %v249_v26  ;;  %v1145_v29 = vpack.c.bf16 %v260_v25, %v259_v24  ;;  %v261_v31 = vld [vmem:[#allocation5 + $0x50] sm:$0xff]  ;;  %v263_v34 = vld [vmem:[#allocation5 + $0x60] sm:$0xff]  ;;  %p1382_p4 = scmp.ne.s32.totalorder %s1842_s9, %s1381_s26  ;;  %s1385_s25 = sshll.u32 %s1489_s8, 4  ;;  %s1386_s25 = int_to_ptr.vmem [resolvable:$false] %s1385_s25 }
  0x5e   : > { %280 = vadd.xlane.f32.xlu1 %v270_v13  ;;  %v275_v30 = vmul.f32 %v250_v27, %v250_v27  ;;  %v262_v32 = vld [vmem:[#allocation5 + $0x58] sm:$0xff]  ;;  %v264_v35 = vld [vmem:[#allocation5 + $0x68] sm:$0xff]  ;;  %v265_v37 = vld [vmem:[#allocation5 + $0x70] sm:$0xff]  ;;  %s1387_s14 = scalar_lea.vmem %s1386_s25, 32  ;;  %p1388_p10 = scmp.lt.s32.totalorder %s1842_s9, %s1386_s25 }
  0x5f   : > { %1168 = vmatpush3.bf16.msra.mxu1 %v1133_v5  ;;  %v1149_v33 = vpack.c.bf16 %v262_v32, %v261_v31  ;;  %v1153_v36 = vpack.c.bf16 %v264_v35, %v263_v34  ;;  %v266_v38 = vld [vmem:[#allocation5 + $0x78] sm:$0xff]  ;;  %v984_v45 = vld [vmem:[%s1920_s2] ss:$0 sm:$0xff]  ;;  %p1383_p6 = pnand %p1382_p4, %p1612_p12  ;;  %p1389_p13 = scmp.lt.s32.totalorder %s1387_s14, %s1381_s26 }
  0x60   : > { %1170 = vmatprep.subr.bf16.mxu1 %v1137_v11  ;;  %v1157_v39 = vpack.c.bf16 %v266_v38, %v265_v37 }
  0x61   : > { %278 = vadd.xlane.f32.xlu0 %v269_v15  ;;  %p1384_p8 = pneg %p1383_p6  ;;  %p1390_p3 = por %p1389_p13, %p1388_p10 }
  0x62   : > { %282 = vadd.xlane.f32.xlu1 %v271_v16 }
  0x63   : > { %1136 = vmatpush3.bf16.xpose.msra.mxu0 %v1133_v5  ;;  %1172 = vmatpush3.bf16.msra.mxu1 %v1137_v11  ;;  %p1391_p7 = pnand %p1390_p3, %p1384_p8 }
  0x64   : > { %1138 = vmatprep.subr.bf16.mxu0 %v1137_v11  ;;  %1174 = vmatprep.subr.bf16.mxu1 %v1141_v22 }
  0x65   : > { %284 = vadd.xlane.f32.xlu0 %v272_v21 }
  0x66   : > { %286 = vadd.xlane.f32.xlu1 %v273_v23 }
  0x67   : > { %1176 = vmatpush3.bf16.msra.mxu1 %v1141_v22 }
  0x68   : > { %1178 = vmatprep.subr.bf16.mxu1 %v1145_v29 }
  0x69   : > { %288 = vadd.xlane.f32.xlu0 %v274_v28 }
  0x6a   : > { %290 = vadd.xlane.f32.xlu1 %v275_v30 }
  0x6b   : > { %1140 = vmatpush3.bf16.xpose.msra.mxu0 %v1137_v11  ;;  %1180 = vmatpush3.bf16.msra.mxu1 %v1145_v29 }
  0x6c   : > { %1142 = vmatprep.subr.bf16.mxu0 %v1141_v22  ;;  %1182 = vmatprep.subr.bf16.mxu1 %v1149_v33 }
  0x6f   : > { %1184 = vmatpush3.bf16.msra.mxu1 %v1149_v33 }
  0x70   : > { %1186 = vmatprep.subr.bf16.mxu1 %v1153_v36 }
  0x73   : > { %1144 = vmatpush3.bf16.xpose.msra.mxu0 %v1141_v22  ;;  %1188 = vmatpush3.bf16.msra.mxu1 %v1153_v36 }
  0x74   : > { %1146 = vmatprep.subr.bf16.mxu0 %v1145_v29  ;;  %1190 = vmatprep.subr.bf16.mxu1 %v1157_v39 }
  0x77   : > { %1192 = vmatpush3.bf16.msra.mxu1 %v1157_v39 }
  0x7b   : > { %1148 = vmatpush3.bf16.xpose.msra.mxu0 %v1145_v29 }
  0x7c   : > { %1150 = vmatprep.subr.bf16.mxu0 %v1149_v33 }
  0x83   : > { %1152 = vmatpush3.bf16.xpose.msra.mxu0 %v1149_v33 }
  0x84   : > { %1154 = vmatprep.subr.bf16.mxu0 %v1153_v36 }
  0x8b   : > { %1156 = vmatpush3.bf16.xpose.msra.mxu0 %v1153_v36 }
  0x8c   : > { %1158 = vmatprep.subr.bf16.mxu0 %v1157_v39 }
  0x93   : > { %1160 = vmatpush3.bf16.xpose.msra.mxu0 %v1157_v39 }
  0x9a   : > { %1074 = vmatmul.mubr.f32.vlgmr.msra.gmra.mrb[0].mxu0 %v244_v12 }
  0x9b   : > { %1076 = vmatprep.mubr.f32.mxu0 %v1681_v9 }
  0x9e   : > { %1077 = vmatmul.mubr.f32.gmra.mrb[2].mxu0 %v246_v14 }
  0x9f   : > { %1079 = vmatprep.mubr.f32.mxu0 %v247_v19 }
  0xa2   : > { %1080 = vmatmul.mubr.f32.gmra.mrb[4].mxu0 %v248_v20 }
  0xa3   : > { %1082 = vmatprep.mubr.f32.mxu0 %v249_v26 }
  0xa6   : > { %1083 = vmatmul.mubr.f32.gmra.mrb[6].mxu0 %v250_v27 }
  0xea   : > { %v277_v40 = vpop.xlane.xlu0 %276 }
  0xeb   : > { %v281_v41 = vpop.xlane.xlu1 %280  ;;  %v403_v51 = vadd.f32 %v984_v45, %v277_v40 }
  0xec   : > { %v405_v62 = vadd.f32 %v984_v45, %v281_v41 }
  0xee   : > { %v279_v42 = vpop.xlane.xlu0 %278 }
  0xef   : > { %v283_v43 = vpop.xlane.xlu1 %282  ;;  %v404_v46 = vadd.f32 %v984_v45, %v279_v42 }
  0xf0   : > { %v406_v55 = vadd.f32 %v984_v45, %v283_v43 }
  0xf2   : > { %v285_v56 = vpop.xlane.xlu0 %284 }
  0xf3   : > { %v287_v53 = vpop.xlane.xlu1 %286  ;;  %v407_v8 = vadd.f32 %v984_v45, %v285_v56 }
  0xf4   : > { %v408_v3 = vadd.f32 %v984_v45, %v287_v53 }
  0xf6   : > { %v289_v14 = vpop.xlane.xlu0 %288 }
  0xf7   : > { %v291_v9 = vpop.xlane.xlu1 %290  ;;  %v409_v24 = vadd.f32 %v984_v45, %v289_v14 }
  0xf8   : > { %v410_v19 = vadd.f32 %v984_v45, %v291_v9 }
 0x16d   : > { %v1075_v47 = vpop.f32.mrb[0].mxu0 }
 0x16e   : > { %v412_v49 = vmul.f32 2.0, %v1075_v47  ;;  %v358_v50 = vpop.f32.mrb[1].mxu0 }
 0x16f   : > { %v411_v52 = vmul.f32 2.0, %v358_v50 }
 0x170   : > { %v420_v54 = vsub.f32 %v404_v46, %v412_v49 }
 0x171   : > { %v419_v57 = vsub.f32 %v403_v51, %v411_v52  ;;  %v1078_v58 = vpop.f32.mrb[2].mxu0 }
 0x172   : > { %v428_v59 = vmax.f32 %v420_v54, 0.0  ;;  %v414_v60 = vmul.f32 2.0, %v1078_v58  ;;  %v368_v61 = vpop.f32.mrb[3].mxu0 }
 0x173   : > { %v427_v63 = vmax.f32 %v419_v57, 0.0  ;;  %v413_v0 = vmul.f32 2.0, %v368_v61 }
 0x174   : > { %v559_v1 = vadd.f32 1e-16, %v428_v59  ;;  %v422_v2 = vsub.f32 %v406_v55, %v414_v60  ;;  %v1701_v4 = vsel %vm437_vm0, %v428_v59, inf }
 0x175   : > { %v558_v5 = vadd.f32 1e-16, %v427_v63  ;;  %v421_v6 = vsub.f32 %v405_v62, %v413_v0  ;;  %v1081_v7 = vpop.f32.mrb[4].mxu0  ;;  %v1705_v10 = vsel %vm437_vm0, %v427_v63, inf }
 0x176   : > { %1275 = vlog2.f32 %v559_v1  ;;  %v430_v11 = vmax.f32 %v422_v2, 0.0  ;;  %v416_v12 = vmul.f32 2.0, %v1081_v7  ;;  %v378_v13 = vpop.f32.mrb[5].mxu0 }
 0x177   : > { %1277 = vlog2.f32 %v558_v5  ;;  %v429_v15 = vmax.f32 %v421_v6, 0.0  ;;  %v415_v16 = vmul.f32 2.0, %v378_v13 }
 0x178   : > { %v561_v17 = vadd.f32 1e-16, %v430_v11  ;;  %v424_v18 = vsub.f32 %v408_v3, %v416_v12  ;;  %v1709_v20 = vsel %vm437_vm0, %v430_v11, inf }
 0x179   : > { %v560_v21 = vadd.f32 1e-16, %v429_v15  ;;  %v423_v22 = vsub.f32 %v407_v8, %v415_v16  ;;  %v1084_v23 = vpop.f32.mrb[6].mxu0  ;;  %v1713_v25 = vsel %vm437_vm0, %v429_v15, inf }
 0x17a   : > { %1279 = vlog2.f32 %v561_v17  ;;  %v432_v26 = vmax.f32 %v424_v18, 0.0  ;;  %v418_v27 = vmul.f32 2.0, %v1084_v23  ;;  %v388_v28 = vpop.f32.mrb[7].mxu0 }
 0x17b   : > { %1281 = vlog2.f32 %v560_v21  ;;  %v431_v29 = vmax.f32 %v423_v22, 0.0  ;;  %v417_v30 = vmul.f32 2.0, %v388_v28 }
 0x17c   : > { %v563_v31 = vadd.f32 1e-16, %v432_v26  ;;  %v426_v32 = vsub.f32 %v410_v19, %v418_v27  ;;  %v1717_v33 = vsel %vm437_vm0, %v432_v26, inf }
 0x17d   : > { %v562_v34 = vadd.f32 1e-16, %v431_v29  ;;  %v425_v35 = vsub.f32 %v409_v24, %v417_v30  ;;  %v1721_v36 = vsel %vm437_vm0, %v431_v29, inf }
 0x17e   : > { %1283 = vlog2.f32 %v563_v31  ;;  %v434_v37 = vmax.f32 %v426_v32, 0.0 }
 0x17f   : > { %1285 = vlog2.f32 %v562_v34  ;;  %v433_v38 = vmax.f32 %v425_v35, 0.0 }
 0x180   : > { %v1276_v39 = vpop.eup %1275  ;;  %v565_v40 = vadd.f32 1e-16, %v434_v37  ;;  %v1725_v41 = vsel %vm437_vm0, %v434_v37, inf }
 0x181   : > { %v1278_v42 = vpop.eup %1277  ;;  %v564_v43 = vadd.f32 1e-16, %v433_v38  ;;  %v569_v45 = vmul.f32 0.6931472, %v1276_v39  ;;  %v1729_v46 = vsel %vm437_vm0, %v433_v38, inf }
 0x182   : > { %1287 = vlog2.f32 %v565_v40  ;;  %v567_v47 = vmul.f32 0.6931472, %v1278_v42 }
 0x183   : > { %1289 = vlog2.f32 %v564_v43  ;;  %v583_v49 = vmul.f32 0.5, %v569_v45 }
 0x184   : > { %v1280_v50 = vpop.eup %1279  ;;  %v582_v51 = vmul.f32 0.5, %v567_v47 }
 0x185   : > { %v1282_v52 = vpop.eup %1281  ;;  %v591_v53 = vsel %vm437_vm0, %v583_v49, -inf  ;;  %v573_v54 = vmul.f32 0.6931472, %v1280_v50 }
 0x186   : > { %600 = vmax.xlane.f32.xlu1 %v591_v53  ;;  %v590_v55 = vsel %vm437_vm0, %v582_v51, -inf  ;;  %v571_v56 = vmul.f32 0.6931472, %v1282_v52 }
 0x187   : > { %598 = vmax.xlane.f32.xlu0 %v590_v55  ;;  %v585_v57 = vmul.f32 0.5, %v573_v54 }
 0x188   : > { %v1284_v58 = vpop.eup %1283  ;;  %v584_v59 = vmul.f32 0.5, %v571_v56 }
 0x189   : > { %v1286_v60 = vpop.eup %1285  ;;  %v593_v61 = vsel %vm437_vm0, %v585_v57, -inf  ;;  %v577_v62 = vmul.f32 0.6931472, %v1284_v58 }
 0x18a   : > { %604 = vmax.xlane.f32.xlu1 %v593_v61  ;;  %v592_v63 = vsel %vm437_vm0, %v584_v59, -inf  ;;  %v575_v0 = vmul.f32 0.6931472, %v1286_v60 }
 0x18b   : > { %602 = vmax.xlane.f32.xlu0 %v592_v63  ;;  %v587_v1 = vmul.f32 0.5, %v577_v62 }
 0x18c   : > { %v1288_v2 = vpop.eup %1287  ;;  %v586_v3 = vmul.f32 0.5, %v575_v0 }
 0x18d   : > { %v1290_v5 = vpop.eup %1289  ;;  %v595_v6 = vsel %vm437_vm0, %v587_v1, -inf  ;;  %v581_v7 = vmul.f32 0.6931472, %v1288_v2 }
 0x18e   : > { %608 = vmax.xlane.f32.xlu1 %v595_v6  ;;  %v594_v8 = vsel %vm437_vm0, %v586_v3, -inf  ;;  %v579_v9 = vmul.f32 0.6931472, %v1290_v5  ;;  %v1792_v5 = vcvt.s32.f32 %v1696_v48 }
 0x18f   : > { %606 = vmax.xlane.f32.xlu0 %v594_v8  ;;  %v589_v11 = vmul.f32 0.5, %v581_v7 }
 0x190   : > { %v588_v12 = vmul.f32 0.5, %v579_v9 }
 0x191   : > { %v597_v13 = vsel %vm437_vm0, %v589_v11, -inf }
 0x192   : > { %612 = vmax.xlane.f32.xlu1 %v597_v13  ;;  %v596_v14 = vsel %vm437_vm0, %v588_v12, -inf  ;;  %vm556_vm0 = vcmask 516096  }
 0x193   : > { %610 = vmax.xlane.f32.xlu0 %v596_v14 }
 0x213   : > { %v601_v15 = vpop.xlane.xlu1 %600 }
 0x214   : > { %v615_v16 = vsub.f32 %v591_v53, %v601_v15  ;;  %v599_v17 = vpop.xlane.xlu0 %598 }
 0x215   : > { %v614_v18 = vsub.f32 %v590_v55, %v599_v17 }
 0x216   : > { %v624_v19 = vmul.f32 1.442695, %v615_v16 }
 0x217   : > { %v622_v21 = vmul.f32 1.442695, %v614_v18  ;;  %v605_v22 = vpop.xlane.xlu1 %604 }
 0x218   : > { %1291 = vpow2.f32 %v624_v19  ;;  %v617_v23 = vsub.f32 %v593_v61, %v605_v22  ;;  %v603_v24 = vpop.xlane.xlu0 %602 }
 0x219   : > { %1293 = vpow2.f32 %v622_v21  ;;  %v616_v26 = vsub.f32 %v592_v63, %v603_v24 }
 0x21a   : > { %v628_v27 = vmul.f32 1.442695, %v617_v23 }
 0x21b   : > { %v626_v28 = vmul.f32 1.442695, %v616_v26  ;;  %v609_v29 = vpop.xlane.xlu1 %608 }
 0x21c   : > { %1295 = vpow2.f32 %v628_v27  ;;  %v619_v30 = vsub.f32 %v595_v6, %v609_v29  ;;  %v607_v31 = vpop.xlane.xlu0 %606 }
 0x21d   : > { %1297 = vpow2.f32 %v626_v28  ;;  %v618_v32 = vsub.f32 %v594_v8, %v607_v31 }
 0x21e   : > { %v632_v34 = vmul.f32 1.442695, %v619_v30 }
 0x21f   : > { %v630_v35 = vmul.f32 1.442695, %v618_v32  ;;  %v613_v37 = vpop.xlane.xlu1 %612 }
 0x220   : > { %1299 = vpow2.f32 %v632_v34  ;;  %v621_v38 = vsub.f32 %v597_v13, %v613_v37  ;;  %v611_v39 = vpop.xlane.xlu0 %610 }
 0x221   : > { %1301 = vpow2.f32 %v630_v35  ;;  %v620_v40 = vsub.f32 %v596_v14, %v611_v39 }
 0x222   : > { %v1747_v42 = vpop.eup %1291  ;;  %v636_v43 = vmul.f32 1.442695, %v621_v38 }
 0x223   : > { %v1749_v45 = vpop.eup %1293  ;;  %v634_v47 = vmul.f32 1.442695, %v620_v40  ;;  %640 = vadd.xlane.f32.xlu1 %v1747_v42 }
 0x224   : > { %1303 = vpow2.f32 %v636_v43  ;;  %638 = vadd.xlane.f32.xlu0 %v1749_v45 }
 0x225   : > { %1305 = vpow2.f32 %v634_v47 }
 0x226   : > { %v1753_v49 = vpop.eup %1295 }
 0x227   : > { %v1755_v50 = vpop.eup %1297  ;;  %644 = vadd.xlane.f32.xlu1 %v1753_v49 }
 0x228   : > { %642 = vadd.xlane.f32.xlu0 %v1755_v50 }
 0x22a   : > { %v1759_v51 = vpop.eup %1299 }
 0x22b   : > { %v1761_v52 = vpop.eup %1301  ;;  %648 = vadd.xlane.f32.xlu1 %v1759_v51 }
 0x22c   : > { %646 = vadd.xlane.f32.xlu0 %v1761_v52 }
 0x22e   : > { %v1765_v53 = vpop.eup %1303 }
 0x22f   : > { %v1767_v54 = vpop.eup %1305  ;;  %652 = vadd.xlane.f32.xlu1 %v1765_v53 }
 0x230   : > { %650 = vadd.xlane.f32.xlu0 %v1767_v54 }
 0x233   : > { %448 = vmin.xlane.f32.xlu1 %v1701_v4 }
 0x234   : > { %446 = vmin.xlane.f32.xlu0 %v1705_v10 }
 0x237   : > { %452 = vmin.xlane.f32.xlu1 %v1709_v20 }
 0x238   : > { %450 = vmin.xlane.f32.xlu0 %v1713_v25 }
 0x23b   : > { %456 = vmin.xlane.f32.xlu1 %v1717_v33 }
 0x23c   : > { %454 = vmin.xlane.f32.xlu0 %v1721_v36 }
 0x23f   : > { %460 = vmin.xlane.f32.xlu1 %v1725_v41 }
 0x240   : > { %458 = vmin.xlane.f32.xlu0 %v1729_v46 }
 0x2b0   : > { %v641_v55 = vpop.xlane.xlu1 %640 }
 0x2b1   : > { %1307 = vrcp.f32 %v641_v55  ;;  %v639_v56 = vpop.xlane.xlu0 %638 }
 0x2b2   : > { %1309 = vrcp.f32 %v639_v56 }
 0x2b4   : > { %v645_v57 = vpop.xlane.xlu1 %644 }
 0x2b5   : > { %1311 = vrcp.f32 %v645_v57  ;;  %v643_v58 = vpop.xlane.xlu0 %642 }
 0x2b6   : > { %1313 = vrcp.f32 %v643_v58 }
 0x2b8   : > { %v1779_v59 = vpop.xlane.xlu1 %648 }
 0x2b9   : > { %1315 = vrcp.f32 %v1779_v59  ;;  %v1782_v60 = vpop.xlane.xlu0 %646 }
 0x2ba   : > { %1317 = vrcp.f32 %v1782_v60 }
 0x2bb   : > { %v1308_v61 = vpop.eup %1307 }
 0x2bc   : > { %v1310_v62 = vpop.eup %1309  ;;  %v663_v63 = vmul.f32 %v1308_v61, %v641_v55  ;;  %v1785_v0 = vpop.xlane.xlu1 %652 }
 0x2bd   : > { %v662_v1 = vmul.f32 %v1310_v62, %v639_v56  ;;  %1319 = vrcp.f32 %v1785_v0  ;;  %v1788_v2 = vpop.xlane.xlu0 %650 }
 0x2be   : > { %v671_v3 = vsub.f32 2.0, %v663_v63  ;;  %1321 = vrcp.f32 %v1788_v2 }
 0x2bf   : > { %v1312_v6 = vpop.eup %1311  ;;  %v670_v7 = vsub.f32 2.0, %v662_v1 }
 0x2c0   : > { %v1314_v8 = vpop.eup %1313  ;;  %v679_v9 = vmul.f32 %v1308_v61, %v671_v3  ;;  %v665_v11 = vmul.f32 %v1312_v6, %v645_v57  ;;  %v449_v12 = vpop.xlane.xlu1 %448 }
 0x2c1   : > { %v678_v13 = vmul.f32 %v1310_v62, %v670_v7  ;;  %v664_v14 = vmul.f32 %v1314_v8, %v643_v58  ;;  %vm463_vm1 = vcmp.eq.f32.partialorder %v1701_v4, %v449_v12  ;;  %v447_v15 = vpop.xlane.xlu0 %446 }
 0x2c2   : > { %v687_v16 = vmul.f32 %v679_v9, %v641_v55  ;;  %v673_v17 = vsub.f32 2.0, %v665_v11  ;;  %vm462_vm2 = vcmp.eq.f32.partialorder %v1705_v10, %v447_v15  ;;  %v472_v18 = vsel %vm463_vm1, %v1792_v5, 128.0 }
 0x2c3   : > { %v1316_v19 = vpop.eup %1315  ;;  %v686_v21 = vmul.f32 %v678_v13, %v639_v56  ;;  %v672_v22 = vsub.f32 2.0, %v664_v14  ;;  %481 = vmin.xlane.f32.xlu1 %v472_v18  ;;  %v471_v23 = vsel %vm462_vm2, %v1792_v5, 128.0 }
 0x2c4   : > { %v1318_v24 = vpop.eup %1317  ;;  %v695_v26 = vsub.f32 2.0, %v687_v16  ;;  %v681_v27 = vmul.f32 %v1312_v6, %v673_v17  ;;  %v667_v28 = vmul.f32 %v1316_v19, %v1779_v59  ;;  %v453_v29 = vpop.xlane.xlu1 %452  ;;  %479 = vmin.xlane.f32.xlu0 %v471_v23 }
 0x2c5   : > { %v680_v4 = vmul.f32 %v1314_v8, %v672_v22  ;;  %v666_v30 = vmul.f32 %v1318_v24, %v1782_v60  ;;  %vm465_vm3 = vcmp.eq.f32.partialorder %v1709_v20, %v453_v29  ;;  %v451_v10 = vpop.xlane.xlu0 %450  ;;  %v694_v31 = vsub.f32 2.0, %v686_v21 }
 0x2c6   : > { %v689_v32 = vmul.f32 %v681_v27, %v645_v57  ;;  %v675_v34 = vsub.f32 2.0, %v667_v28  ;;  %vm464_vm4 = vcmp.eq.f32.partialorder %v1713_v25, %v451_v10  ;;  %v474_v35 = vsel %vm465_vm3, %v1792_v5, 128.0 }
 0x2c7   : > { %v1320_v37 = vpop.eup %1319  ;;  %v688_v38 = vmul.f32 %v680_v4, %v643_v58  ;;  %v674_v39 = vsub.f32 2.0, %v666_v30  ;;  %485 = vmin.xlane.f32.xlu1 %v474_v35  ;;  %v473_v40 = vsel %vm464_vm4, %v1792_v5, 128.0  ;;  %v702_v43 = vmul.f32 %v694_v31, %v678_v13 }
 0x2c8   : > { %v1322_v47 = vpop.eup %1321  ;;  %v697_v55 = vsub.f32 2.0, %v689_v32  ;;  %v683_v56 = vmul.f32 %v1316_v19, %v675_v34  ;;  %v669_v20 = vmul.f32 %v1320_v37, %v1785_v0  ;;  %v457_v61 = vpop.xlane.xlu1 %456  ;;  %483 = vmin.xlane.f32.xlu0 %v473_v40  ;;  %v703_v57 = vmul.f32 %v695_v26, %v679_v9 }
 0x2c9   : > { %v696_v62 = vsub.f32 2.0, %v688_v38  ;;  %v682_v63 = vmul.f32 %v1318_v24, %v674_v39  ;;  %v668_v25 = vmul.f32 %v1322_v47, %v1788_v2  ;;  %vm467_vm5 = vcmp.eq.f32.partialorder %v1717_v33, %v457_v61  ;;  %v455_v58 = vpop.xlane.xlu0 %454 }
 0x2ca   : > { %v691_v1 = vmul.f32 %v683_v56, %v1779_v59  ;;  %v677_v3 = vsub.f32 2.0, %v669_v20  ;;  %vm466_vm6 = vcmp.eq.f32.partialorder %v1721_v36, %v455_v58  ;;  %v476_v6 = vsel %vm467_vm5, %v1792_v5, 128.0 }
 0x2cb   : > { %v690_v7 = vmul.f32 %v682_v63, %v1782_v60  ;;  %v676_v8 = vsub.f32 2.0, %v668_v25  ;;  %489 = vmin.xlane.f32.xlu1 %v476_v6  ;;  %v710_v9 = vmul.f32 %v1749_v45, %v702_v43  ;;  %v711_v11 = vmul.f32 %v1747_v42, %v703_v57 }
 0x2cc   : > { %v699_v12 = vsub.f32 2.0, %v691_v1  ;;  %v685_v13 = vmul.f32 %v1320_v37, %v677_v3  ;;  %v461_v14 = vpop.xlane.xlu1 %460  ;;  %v475_v33 = vsel %vm466_vm6, %v1792_v5, 128.0  ;;  %v704_v15 = vmul.f32 %v696_v62, %v680_v4 }
 0x2cd   : > { %v698_v59 = vsub.f32 2.0, %v690_v7  ;;  %v684_v16 = vmul.f32 %v1322_v47, %v676_v8  ;;  %1117 = vmatprep.mubr.f32.mxu1 %v710_v9  ;;  %vm469_vm7 = vcmp.eq.f32.partialorder %v1725_v41, %v461_v14  ;;  %487 = vmin.xlane.f32.xlu0 %v475_v33  ;;  %v459_v36 = vpop.xlane.xlu0 %458  ;;  %v705_v60 = vmul.f32 %v697_v55, %v681_v27 }
 0x2ce   : > { %v693_v17 = vmul.f32 %v685_v13, %v1785_v0  ;;  %1118 = vmatmul.mubr.f32.vlgmr.msra.gmra.mrb[0].mxu1 %v711_v11  ;;  %vm468_vm8 = vcmp.eq.f32.partialorder %v1729_v46, %v459_v36  ;;  %v478_v42 = vsel %vm469_vm7, %v1792_v5, 128.0  ;;  %v712_v45 = vmul.f32 %v1755_v50, %v704_v15 }
 0x2cf   : > { %v692_v18 = vmul.f32 %v684_v16, %v1788_v2  ;;  %493 = vmin.xlane.f32.xlu1 %v478_v42  ;;  %v477_v19 = vsel %vm468_vm8, %v1792_v5, 128.0  ;;  %v706_v21 = vmul.f32 %v698_v59, %v682_v63  ;;  %v713_v41 = vmul.f32 %v1753_v49, %v705_v60 }
 0x2d0   : > { %v701_v22 = vsub.f32 2.0, %v693_v17  ;;  %1120 = vmatprep.mubr.f32.mxu1 %v712_v45  ;;  %v707_v23 = vmul.f32 %v699_v12, %v683_v56  ;;  %v504_v49 = vshrl.u32 %v435_v44, 7  ;;  %v507_v27 = vadd.s32 4294967288, %v1696_v48 }
 0x2d1   : > { %v700_v24 = vsub.f32 2.0, %v692_v18  ;;  %491 = vmin.xlane.f32.xlu0 %v477_v19  ;;  %v714_v0 = vmul.f32 %v1761_v52, %v706_v21  ;;  %v514_v30 = vadd.s32 4294967280, %v1696_v48  ;;  %v521_v34 = vadd.s32 4294967272, %v1696_v48 }
 0x2d2   : > { %1121 = vmatmul.mubr.f32.gmra.mrb[2].mxu1 %v713_v41  ;;  %v715_v50 = vmul.f32 %v1759_v51, %v707_v23  ;;  %v709_v26 = vmul.f32 %v701_v22, %v685_v13  ;;  %v510_v10 = vsub.s32 %v507_v27, %v504_v49  ;;  %v505_v31 = vsub.s32 %v1696_v48, %v504_v49 }
 0x2d3   : > { %1123 = vmatprep.mubr.f32.mxu1 %v714_v0  ;;  %v708_v46 = vmul.f32 %v700_v24, %v684_v16  ;;  %v517_v37 = vsub.s32 %v514_v30, %v504_v49  ;;  %v528_v38 = vadd.s32 4294967264, %v1696_v48  ;;  %v524_v55 = vsub.s32 %v521_v34, %v504_v49 }
 0x2d4   : > { %v717_v5 = vmul.f32 %v1765_v53, %v709_v26  ;;  %v535_v61 = vadd.s32 4294967256, %v1696_v48  ;;  %v542_v58 = vadd.s32 4294967248, %v1696_v48  ;;  %v549_v3 = vadd.s32 4294967240, %v1696_v48 }
 0x2d5   : > { %v716_v2 = vmul.f32 %v1767_v54, %v708_v46  ;;  %v531_v63 = vsub.s32 %v528_v38, %v504_v49 }
 0x2d6   : > { %1124 = vmatmul.mubr.f32.gmra.mrb[4].mxu1 %v715_v50  ;;  %v538_v12 = vsub.s32 %v535_v61, %v504_v49  ;;  %v545_v15 = vsub.s32 %v542_v58, %v504_v49  ;;  %v552_v36 = vsub.s32 %v549_v3, %v504_v49 }
 0x2d7   : > { %1126 = vmatprep.mubr.f32.mxu1 %v716_v2 }
 0x2da   : > { %1127 = vmatmul.mubr.f32.gmra.mrb[6].mxu1 %v717_v5 }
 0x350   : > { %v482_v28 = vpop.xlane.xlu1 %481 }
 0x351   : > { %v1195_v29 = vtrunc.f32 %v482_v28  ;;  %v480_v52 = vpop.xlane.xlu0 %479 }
 0x352   : > { %v1193_v4 = vtrunc.f32 %v480_v52 }
 0x353   : > { %v1196_v51 = vcvt.f32.s32 %v1195_v29 }
 0x354   : > { %v1194_v54 = vcvt.f32.s32 %v1193_v4  ;;  %v486_v32 = vpop.xlane.xlu1 %485 }
 0x355   : > { %v484_v53 = vpop.xlane.xlu0 %483  ;;  %v1199_v35 = vtrunc.f32 %v486_v32  ;;  %v511_v39 = vrot.slane %v1196_v51, %v510_v10 }
 0x356   : > { %v1197_v44 = vtrunc.f32 %v484_v53  ;;  %v506_v40 = vrot.slane %v1194_v54, %v505_v31 }
 0x357   : > { %v1200_v56 = vcvt.f32.s32 %v1199_v35 }
 0x358   : > { %v1198_v43 = vcvt.f32.s32 %v1197_v44  ;;  %v490_v47 = vpop.xlane.xlu1 %489  ;;  %v513_v1 = vsel %vm512_vm9, %v511_v39, %v506_v40 }
 0x359   : > { %v1203_v57 = vtrunc.f32 %v490_v47  ;;  %v525_v11 = vrot.slane %v1200_v56, %v524_v55 }
 0x35a   : > { %v518_v20 = vrot.slane %v1198_v43, %v517_v37  ;;  %v488_v62 = vpop.xlane.xlu0 %487 }
 0x35b   : > { %v1201_v25 = vtrunc.f32 %v488_v62  ;;  %v1204_v13 = vcvt.f32.s32 %v1203_v57 }
 0x35c   : > { %v494_v6 = vpop.xlane.xlu1 %493  ;;  %v520_v7 = vsel %vm519_vm10, %v518_v20, %v513_v1 }
 0x35d   : > { %v1202_v8 = vcvt.f32.s32 %v1201_v25  ;;  %v1207_v9 = vtrunc.f32 %v494_v6  ;;  %v527_v16 = vsel %vm526_vm11, %v525_v11, %v520_v7  ;;  %v539_v42 = vrot.slane %v1204_v13, %v538_v12 }
 0x35e   : > { %v492_v14 = vpop.xlane.xlu0 %491 }
 0x35f   : > { %v532_v33 = vrot.slane %v1202_v8, %v531_v63  ;;  %v1205_v59 = vtrunc.f32 %v492_v14  ;;  %v1208_v60 = vcvt.f32.s32 %v1207_v9 }
 0x361   : > { %v534_v17 = vsel %vm533_vm12, %v532_v33, %v527_v16  ;;  %v1206_v48 = vcvt.f32.s32 %v1205_v59  ;;  %v553_v18 = vrot.slane %v1208_v60, %v552_v36 }
 0x362   : > { %v541_v19 = vsel %vm540_vm13, %v539_v42, %v534_v17 }
 0x363   : > { %v546_v45 = vrot.slane %v1206_v48, %v545_v15 }
 0x365   : > { %v548_v21 = vsel %vm547_vm14, %v546_v45, %v541_v19 }
 0x366   : > { %v555_v22 = vsel %vm554_vm15, %v553_v18, %v548_v21 }
 0x367   : > { %557 = vst.msk [vmem:[%s240_s13] sm:$0x1] %vm556_vm0, %v555_v22 }
 0x368   : > { %1394 = shalt.err (!%p1391_p7)
}
 0x369   : > { %s1395_s5 = scalar_lea.hbm %s1840_s6, 16  ;;  %s1399_s23 = scalar_lea.hbm %s1922_s4, 32 }
 0x36a   : > { %p1396_p9 = scmp.ne.s32.totalorder %s1840_s6, %s1395_s5  ;;  %p1400_p5 = scmp.lt.u32.totalorder %s1840_s6, %s1922_s4 }
 0x36b   : > { %p1401_p11 = scmp.lt.u32.totalorder %s1399_s23, %s1395_s5  ;;  %p1403_p4 = scmp.lt.u32.totalorder %s1395_s5, %s1840_s6 }
 0x36c   : > { %p1397_p1 = pnand %p1396_p9, %p1612_p12 }
 0x36d   : > { %p1402_p2 = por %p1401_p11, %p1400_p5 }
 0x36e   : > { %p1398_p0 = pneg %p1397_p1 }
 0x36f   : > { %p1404_p6 = por %p1403_p4, %p1402_p2 }
 0x371   : > { %p1405_p8 = pnand %p1404_p6, %p1398_p0 }
 0x373   : > { %1408 = shalt.err (!%p1405_p8)
}
 0x374   : > { %1216 = dma.vmem_to_hbm [thread:$0]  (%p1612_p12), %s1842_s9, 16, %s1840_s6, %s837_s7  }
 0x375   : > { %s234_s28 = scalar_lea.vmem [#allocation7], %s981_s20  ;;  %s992_s26 = sshll.u32 %s1539_s19, 10 }
 0x376   : > { %s849_s10 = sshll.u32 %s234_s28, 4  ;;  %s1874_s6 = scalar_lea.hbm %s1921_s3, %s992_s26  ;;  %s1869_s10 = int_to_ptr.vmem [resolvable:$true] %s849_s10 }
 0x377   : > { %s832_s7 = scalar_lea.sflag [#allocation4], %s1663_s11  ;;  %s1409_s8 = scalar_lea.vmem %s1869_s10, 1024 }
 0x378   : > { %p1410_p10 = scmp.ne.s32.totalorder %s1869_s10, %s1409_s8  ;;  %s1490_s19 = smov [#allocation7]  }
 0x379   : > { %s1413_s25 = sshll.u32 %s1490_s19, 4  ;;  %s1414_s25 = int_to_ptr.vmem [resolvable:$false] %s1413_s25 }
 0x37a   : > { %p1411_p13 = pnand %p1410_p10, %p1612_p12  ;;  %s1415_s14 = scalar_lea.vmem %s1414_s25, 2048 }
 0x37b   : > { %p1416_p7 = scmp.lt.s32.totalorder %s1869_s10, %s1414_s25  ;;  %p1417_p9 = scmp.lt.s32.totalorder %s1415_s14, %s1409_s8 }
 0x37c   : > { %p1412_p3 = pneg %p1411_p13 }
 0x37d   : > { %p1418_p1 = por %p1417_p9, %p1416_p7 }
 0x37f   : > { %p1419_p0 = pnand %p1418_p1, %p1412_p3 }
 0x3a1   : > { %v1119_v41 = vpop.f32.mrb[0].mxu1 }
 0x3a2   : > { %824 = vst [vmem:[%s234_s28 + $0x8] sm:$0xff] %v1119_v41  ;;  %v784_v23 = vpop.f32.mrb[1].mxu1 }
 0x3a3   : > { %823 = vst [vmem:[%s234_s28] sm:$0xff] %v784_v23 }
 0x3a5   : > { %v1122_v24 = vpop.f32.mrb[2].mxu1 }
 0x3a6   : > { %826 = vst [vmem:[%s234_s28 + $0x18] sm:$0xff] %v1122_v24  ;;  %v794_v0 = vpop.f32.mrb[3].mxu1 }
 0x3a7   : > { %825 = vst [vmem:[%s234_s28 + $0x10] sm:$0xff] %v794_v0 }
 0x3a9   : > { %v1125_v46 = vpop.f32.mrb[4].mxu1 }
 0x3aa   : > { %828 = vst [vmem:[%s234_s28 + $0x28] sm:$0xff] %v1125_v46  ;;  %v804_v50 = vpop.f32.mrb[5].mxu1 }
 0x3ab   : > { %827 = vst [vmem:[%s234_s28 + $0x20] sm:$0xff] %v804_v50 }
 0x3ad   : > { %v1128_v26 = vpop.f32.mrb[6].mxu1 }
 0x3ae   : > { %830 = vst [vmem:[%s234_s28 + $0x38] sm:$0xff] %v1128_v26  ;;  %v814_v2 = vpop.f32.mrb[7].mxu1 }
 0x3af   : > { %829 = vst [vmem:[%s234_s28 + $0x30] sm:$0xff] %v814_v2 }
 0x3b0   : > { %1422 = shalt.err (!%p1419_p0)
}
 0x3b1   : > { %s1423_s5 = scalar_lea.hbm %s1874_s6, 1024  ;;  %s1427_s23 = scalar_lea.hbm %s1921_s3, 2048 }
 0x3b2   : > { %p1424_p5 = scmp.ne.s32.totalorder %s1874_s6, %s1423_s5  ;;  %p1428_p4 = scmp.lt.u32.totalorder %s1874_s6, %s1921_s3 }
 0x3b3   : > { %p1429_p6 = scmp.lt.u32.totalorder %s1427_s23, %s1423_s5  ;;  %p1431_p10 = scmp.lt.u32.totalorder %s1423_s5, %s1874_s6 }
 0x3b4   : > { %p1425_p11 = pnand %p1424_p5, %p1612_p12 }
 0x3b5   : > { %p1430_p8 = por %p1429_p6, %p1428_p4 }
 0x3b6   : > { %p1426_p2 = pneg %p1425_p11 }
 0x3b7   : > { %p1432_p13 = por %p1431_p10, %p1430_p8 }
 0x3b9   : > { %p1433_p3 = pnand %p1432_p13, %p1426_p2 }
 0x3bb   : > { %1436 = shalt.err (!%p1433_p3)
}
 0x3bc   : > { %s1491_s28 = smov 128   ;;  %s1492_s26 = smov 8  }
 0x3bd   : > { %1215 = dma.vmem_to_hbm [thread:$0]  (%p1612_p12), %s1869_s10, 1024, %s1874_s6, %s832_s7, %s1491_s28, %s1491_s28, %s1492_s26  }
 0x3be PF: > { %s877_s20 = sand.u32 1, %s1471_s15   ;;  %p1937_p7 = scmp.ne.s32.totalorder %s1927_s22, 0 }
 0x3bf   : > { %p1938_p9 = scmp.ge.s32.totalorder %s1483_s18, 2  ;;  %s878_s9 = scalar_lea.sflag [#allocation4], %s877_s20 }
 0x3c1   : > { %p1228_p1 = pnand %p1938_p9, %p1937_p7 }
 0x3c3   : > { %1462 = dma.done.wait (!%p1228_p1), %s878_s9, 1024  }
 0x3c4   : > { %1464 = vsyncadd (!%p1228_p1), %s878_s9, 4294966272  ;;  %s887_s8 = scalar_lea.sflag [#allocation9], %s877_s20 }
 0x3c5   : > { %1466 = dma.done.wait (!%p1228_p1), %s887_s8, 16  }
 0x3c6   : > { %1468 = vsyncadd (!%p1228_p1), %s887_s8, 4294967280  ;;  %p22_p12 = scmp.ge.s32.totalorder %s1574_s27, 4   ;;  %s1939_s15 = smov %s1475_s16 }
 0x3c7   : > { %s1940_s16 = smov %s1479_s17  ;;  %s1941_s17 = smov %s1608_s24 }
 0x3c8   : > { %s1942_s18 = smov %s1574_s27  ;;  %24 = sbr.rel (!%p22_p12) target bundleno = 8 (0x8), region = 98 }
 0x3cf   :  { %891 = vsyncpa [#allocation3], 1 }
 0x3d0   :  { %893 = vsyncpa [#allocation3 + $0x1], 1 }
 0x3d1   :  { %894 = vsyncpa [#allocation6], 1 }
 0x3d2   :  { %895 = vsyncpa [#allocation4], 1 }
 0x3d3   :  { %897 = vsyncpa [#allocation4 + $0x1], 1 }
 0x3d4   :  { %898 = vsyncpa [#allocation9], 1 }
 0x3d5   :  { %900 = vsyncpa [#allocation9 + $0x1], 1 }

</bundles_post_ra>
